<compile_context>
chip_gen: v7x
topology: tpu7x:2x2x1
jax: 0.10.0
libtpu: 0.0.40
codegen_flags: <defaults>
</compile_context>

<pallas_src>
import functools

import jax
import jax.numpy as jnp
from jax.experimental import pallas as pl
from jax.experimental.pallas import tpu as pltpu


def _round_up(x, m):
    return (x + m - 1) // m * m


def _regressor_kernel(x_ref, w1_ref, b1_ref, w2_ref, b2_ref, w3_ref, b3_ref, o_ref):
    # x tile: (tb, in_dim).  Weights/biases are VMEM-resident (constant
    # index_map), so only x and the (tb, 1) output move per grid step.
    # Matmuls accumulate in f32 on the MXU; bias add + ReLU stay f32 on the
    # VPU (v5e has no bf16 VPU path).  The .astype() casts below happen in
    # VMEM only and never change HBM traffic.
    x = x_ref[...]

    # Layer 1: Linear(in_dim -> 50) + ReLU
    h1 = jnp.dot(x.astype(w1_ref.dtype), w1_ref[...],
                 preferred_element_type=jnp.float32)
    h1 = jnp.maximum(h1 + b1_ref[...], 0.0)

    # Layer 2: Linear(50 -> 25) + ReLU
    h2 = jnp.dot(h1.astype(w2_ref.dtype), w2_ref[...],
                 preferred_element_type=jnp.float32)
    h2 = jnp.maximum(h2 + b2_ref[...], 0.0)

    # Output: Linear(25 -> out_dim)  (narrow N; nowhere near compute roofline)
    out = jnp.dot(h2.astype(w3_ref.dtype), w3_ref[...],
                  preferred_element_type=jnp.float32)
    o_ref[...] = (out + b3_ref[...]).astype(o_ref.dtype)


@functools.partial(jax.jit, static_argnames=("tile_b",))
def regressor_forward(x, params, *, tile_b=4096):
    """x: (B, input_dim). params: dict w1/b1/w2/b2/w3/b3.

    Weights stored (in_features, out_features); biases (1, out_features).
    x may be float32 or bfloat16; accumulation / bias / ReLU are always f32.
    tile_b can be raised (8192+) on v6e/v7x together with a larger
    vmem_limit_bytes; the 4096-row default fits comfortably within a 32 MiB
    scoped-VMEM budget on all generations.
    """
    w1, b1 = params["w1"], params["b1"]
    w2, b2 = params["w2"], params["b2"]
    w3, b3 = params["w3"], params["b3"]
    B, in_dim = x.shape
    h1_dim, h2_dim, out_dim = w1.shape[1], w2.shape[1], w3.shape[1]

    # Batch tiling: rows per tile are a multiple of 8 (sublane).  Choosing
    # tb = round_up(cdiv(B, n_tiles), 8) keeps batch padding to < 8 rows per
    # tile (avoids the up-to-2x waste of round_up(B, tile_b) when B is just
    # above a tile multiple).  Ask for >= 2 grid steps when there is enough
    # work so both v7x TensorCores participate ("parallel" grid axis).
    n_tiles = max(pl.cdiv(B, tile_b), 1)
    if B >= 16 and n_tiles < 2:
        n_tiles = 2
    tb = _round_up(pl.cdiv(B, n_tiles), 8)
    b_pad = n_tiles * tb

    # No lane padding, no staging copy when the batch already divides evenly.
    if b_pad == B:
        x_in = x
    else:
        x_in = jnp.zeros((b_pad, in_dim), x.dtype).at[:B, :].set(x)

    # Biases kept f32 so the epilogue is exact regardless of weight dtype.
    b1f = b1.astype(jnp.float32)
    b2f = b2.astype(jnp.float32)
    b3f = b3.astype(jnp.float32)

    batch_tile = lambda shape: pl.BlockSpec(shape, lambda i: (i, 0))
    resident = lambda shape: pl.BlockSpec(shape, lambda i: (0, 0))

    # Accurate (low) cost hint: this kernel is HBM-bound, not MXU-bound.
    x_bytes = b_pad * in_dim * jnp.dtype(x.dtype).itemsize
    param_bytes = sum(int(a.size) * jnp.dtype(a.dtype).itemsize
                      for a in (w1, w2, w3, b1f, b2f, b3f))
    cost = pl.CostEstimate(
        flops=2 * b_pad * (in_dim * h1_dim + h1_dim * h2_dim + h2_dim * out_dim),
        transcendentals=0,
        bytes_accessed=x_bytes + b_pad * out_dim * 4 + param_bytes,
    )

    out = pl.pallas_call(
        _regressor_kernel,
        out_shape=jax.ShapeDtypeStruct((b_pad, out_dim), jnp.float32),
        grid=(n_tiles,),
        in_specs=[
            batch_tile((tb, in_dim)),        # x: tiled over batch, unpadded lanes
            resident((in_dim, h1_dim)),      # w1 stays VMEM-resident
            resident((1, h1_dim)),           # b1
            resident((h1_dim, h2_dim)),      # w2
            resident((1, h2_dim)),           # b2
            resident((h2_dim, out_dim)),     # w3 (narrow output column)
            resident((1, out_dim)),          # b3
        ],
        out_specs=batch_tile((tb, out_dim)),  # real-width output, no lane padding
        compiler_params=pltpu.CompilerParams(
            dimension_semantics=("parallel",),
            vmem_limit_bytes=32 * 1024 * 1024,
        ),
        cost_estimate=cost,
    )(x_in, w1, b1f, w2, b2f, w3, b3f)

    # Only the (cheap) batch-padding rows are sliced away; no lane slice.
    return out[:B]


def init_params(key, input_dim=50, output_dim=1):
    """Deterministic init mimicking PyTorch nn.Linear default (uniform ±1/sqrt(fan_in)).
    Weights stored as (in_features, out_features)."""
    dims = [(input_dim, 50), (50, 25), (25, output_dim)]
    names = [("w1", "b1"), ("w2", "b2"), ("w3", "b3")]
    params = {}
    for (fan_in, fan_out), (wn, bn) in zip(dims, names):
        key, kw, kb = jax.random.split(key, 3)
        bound = 1.0 / (fan_in ** 0.5)
        params[wn] = jax.random.uniform(
            kw, (fan_in, fan_out), jnp.float32, minval=-bound, maxval=bound)
        params[bn] = jax.random.uniform(
            kb, (1, fan_out), jnp.float32, minval=-bound, maxval=bound)
    return params


def _reference_forward(x, params):
    h1 = jnp.maximum(x @ params["w1"] + params["b1"], 0.0)
    h2 = jnp.maximum(h1 @ params["w2"] + params["b2"], 0.0)
    return h2 @ params["w3"] + params["b3"]


if __name__ == "__main__":
    key = jax.random.PRNGKey(0)
    k_params, k_x, k_x2 = jax.random.split(key, 3)

    batch, input_dim, output_dim = 8, 50, 1
    params = init_params(k_params, input_dim=input_dim, output_dim=output_dim)
    x = jax.random.normal(k_x, (batch, input_dim), jnp.float32)

    # f32 path, single tile: exact match vs reference.
    out = jax.block_until_ready(regressor_forward(x, params))
    ref = _reference_forward(x, params)
    assert out.shape == (batch, output_dim), out.shape
    assert jnp.allclose(out, ref, atol=1e-5, rtol=1e-5), "f32 mismatch vs reference"

    # Multi-tile grid + batch-padding path (B not divisible by the tile).
    x2 = jax.random.normal(k_x2, (200, input_dim), jnp.float32)
    out2 = jax.block_until_ready(regressor_forward(x2, params, tile_b=64))
    ref2 = _reference_forward(x2, params)
    assert out2.shape == (200, output_dim), out2.shape
    assert jnp.allclose(out2, ref2, atol=1e-5, rtol=1e-5), "tiled f32 mismatch"

    # Default (large-tile) config on the same data.
    out2d = jax.block_until_ready(regressor_forward(x2, params))
    assert jnp.allclose(out2d, ref2, atol=1e-5, rtol=1e-5), "default-tile f32 mismatch"

    # bf16 activations + weights (caller-supplied bf16 -> halved x HBM reads);
    # accumulation/bias/ReLU stay f32 in-kernel.  Looser tolerance.
    params_bf16 = {k: (v.astype(jnp.bfloat16) if k.startswith("w") else v)
                   for k, v in params.items()}
    out_bf16 = jax.block_until_ready(
        regressor_forward(x2.astype(jnp.bfloat16), params_bf16))
    assert jnp.allclose(out_bf16, ref2, atol=1e-1, rtol=1e-1), "bf16 mismatch"

    print("KERNEL_OK")
</pallas_src>

<mosaic_0001>
module attributes {stable_mosaic.version = 11 : i64} {
  func.func @_regressor_kernel(%arg0: i32, %arg1: memref<8x50xf32, #tpu.memory_space<vmem>>, %arg2: memref<50x50xf32, #tpu.memory_space<vmem>>, %arg3: memref<1x50xf32, #tpu.memory_space<vmem>>, %arg4: memref<50x25xf32, #tpu.memory_space<vmem>>, %arg5: memref<1x25xf32, #tpu.memory_space<vmem>>, %arg6: memref<25x1xf32, #tpu.memory_space<vmem>>, %arg7: memref<1x1xf32, #tpu.memory_space<vmem>>, %arg8: memref<8x1xf32, #tpu.memory_space<vmem>>) attributes {dimension_semantics = [#tpu.dimension_semantics<parallel>], iteration_bounds = array<i64: 1>, scalar_prefetch = 0 : i64, scratch_operands = 0 : i64, tpu.core_type = #tpu.core_type<tc>, window_params = [{transform_indices = @transform_0, window_bounds = array<i64: 8, 50>}, {pipeline_mode = #tpu.pipeline_mode<synchronous>, transform_indices = @transform_1, window_bounds = array<i64: 50, 50>}, {pipeline_mode = #tpu.pipeline_mode<synchronous>, transform_indices = @transform_2, window_bounds = array<i64: 1, 50>}, {pipeline_mode = #tpu.pipeline_mode<synchronous>, transform_indices = @transform_3, window_bounds = array<i64: 50, 25>}, {pipeline_mode = #tpu.pipeline_mode<synchronous>, transform_indices = @transform_4, window_bounds = array<i64: 1, 25>}, {pipeline_mode = #tpu.pipeline_mode<synchronous>, transform_indices = @transform_5, window_bounds = array<i64: 25, 1>}, {pipeline_mode = #tpu.pipeline_mode<synchronous>, transform_indices = @transform_6, window_bounds = array<i64: 1, 1>}, {transform_indices = @transform_7, window_bounds = array<i64: 8, 1>}]} {
    %c0 = arith.constant 0 : index
    %c0_0 = arith.constant 0 : index
    %0 = vector.load %arg1[%c0, %c0_0] : memref<8x50xf32, #tpu.memory_space<vmem>>, vector<8x50xf32>
    %c0_1 = arith.constant 0 : index
    %c0_2 = arith.constant 0 : index
    %1 = vector.load %arg2[%c0_1, %c0_2] : memref<50x50xf32, #tpu.memory_space<vmem>>, vector<50x50xf32>
    %cst = arith.constant dense<0.000000e+00> : vector<8x50xf32>
    %2 = tpu.matmul %0, %1, %cst {dimension_numbers = #tpu.dot_dimension_numbers<[1], [0], [0], [1], [0, 0, 1, 1], [], []>} : vector<8x50xf32>, vector<50x50xf32>, vector<8x50xf32> -> vector<8x50xf32>
    %c0_3 = arith.constant 0 : index
    %c0_4 = arith.constant 0 : index
    %3 = vector.load %arg3[%c0_3, %c0_4] : memref<1x50xf32, #tpu.memory_space<vmem>>, vector<1x50xf32>
    %4 = vector.broadcast %3 : vector<1x50xf32> to vector<8x50xf32>
    %5 = arith.addf %2, %4 : vector<8x50xf32>
    %cst_5 = arith.constant 0.000000e+00 : f32
    %6 = vector.broadcast %cst_5 : f32 to vector<8x50xf32>
    %7 = arith.maximumf %5, %6 : vector<8x50xf32>
    %c0_6 = arith.constant 0 : index
    %c0_7 = arith.constant 0 : index
    %8 = vector.load %arg4[%c0_6, %c0_7] : memref<50x25xf32, #tpu.memory_space<vmem>>, vector<50x25xf32>
    %cst_8 = arith.constant dense<0.000000e+00> : vector<8x25xf32>
    %9 = tpu.matmul %7, %8, %cst_8 {dimension_numbers = #tpu.dot_dimension_numbers<[1], [0], [0], [1], [0, 0, 1, 1], [], []>} : vector<8x50xf32>, vector<50x25xf32>, vector<8x25xf32> -> vector<8x25xf32>
    %c0_9 = arith.constant 0 : index
    %c0_10 = arith.constant 0 : index
    %10 = vector.load %arg5[%c0_9, %c0_10] : memref<1x25xf32, #tpu.memory_space<vmem>>, vector<1x25xf32>
    %11 = vector.broadcast %10 : vector<1x25xf32> to vector<8x25xf32>
    %12 = arith.addf %9, %11 : vector<8x25xf32>
    %cst_11 = arith.constant 0.000000e+00 : f32
    %13 = vector.broadcast %cst_11 : f32 to vector<8x25xf32>
    %14 = arith.maximumf %12, %13 : vector<8x25xf32>
    %c0_12 = arith.constant 0 : index
    %c0_13 = arith.constant 0 : index
    %15 = vector.load %arg6[%c0_12, %c0_13] : memref<25x1xf32, #tpu.memory_space<vmem>>, vector<25x1xf32>
    %cst_14 = arith.constant dense<0.000000e+00> : vector<8x1xf32>
    %16 = tpu.matmul %14, %15, %cst_14 {dimension_numbers = #tpu.dot_dimension_numbers<[1], [0], [0], [1], [0, 0, 1, 1], [], []>} : vector<8x25xf32>, vector<25x1xf32>, vector<8x1xf32> -> vector<8x1xf32>
    %c0_15 = arith.constant 0 : index
    %c0_16 = arith.constant 0 : index
    %17 = vector.load %arg7[%c0_15, %c0_16] : memref<1x1xf32, #tpu.memory_space<vmem>>, vector<1x1xf32>
    %18 = vector.broadcast %17 : vector<1x1xf32> to vector<8x1xf32>
    %19 = arith.addf %16, %18 : vector<8x1xf32>
    %c0_17 = arith.constant 0 : index
    %c0_18 = arith.constant 0 : index
    %20 = vector.load %arg8[%c0_17, %c0_18] : memref<8x1xf32, #tpu.memory_space<vmem>>, vector<8x1xf32>
    tpu.vector_store %arg8[%c0_17, %c0_18], %19 {strides = array<i32>} : memref<8x1xf32, #tpu.memory_space<vmem>>, vector<8x1xf32>,
    return
  }
  func.func @transform_0(%arg0: i32) -> (i32, i32) {
    %c0_i32 = arith.constant 0 : i32
    %c0_i32_0 = arith.constant 0 : i32
    return %arg0, %c0_i32 : i32, i32
  }
  func.func @transform_1(%arg0: i32) -> (i32, i32) {
    %c0_i32 = arith.constant 0 : i32
    %c0_i32_0 = arith.constant 0 : i32
    %c0_i32_1 = arith.constant 0 : i32
    return %c0_i32, %c0_i32_0 : i32, i32
  }
  func.func @transform_2(%arg0: i32) -> (i32, i32) {
    %c0_i32 = arith.constant 0 : i32
    %c0_i32_0 = arith.constant 0 : i32
    %c0_i32_1 = arith.constant 0 : i32
    return %c0_i32, %c0_i32_0 : i32, i32
  }
  func.func @transform_3(%arg0: i32) -> (i32, i32) {
    %c0_i32 = arith.constant 0 : i32
    %c0_i32_0 = arith.constant 0 : i32
    %c0_i32_1 = arith.constant 0 : i32
    return %c0_i32, %c0_i32_0 : i32, i32
  }
  func.func @transform_4(%arg0: i32) -> (i32, i32) {
    %c0_i32 = arith.constant 0 : i32
    %c0_i32_0 = arith.constant 0 : i32
    %c0_i32_1 = arith.constant 0 : i32
    return %c0_i32, %c0_i32_0 : i32, i32
  }
  func.func @transform_5(%arg0: i32) -> (i32, i32) {
    %c0_i32 = arith.constant 0 : i32
    %c0_i32_0 = arith.constant 0 : i32
    %c0_i32_1 = arith.constant 0 : i32
    return %c0_i32, %c0_i32_0 : i32, i32
  }
  func.func @transform_6(%arg0: i32) -> (i32, i32) {
    %c0_i32 = arith.constant 0 : i32
    %c0_i32_0 = arith.constant 0 : i32
    %c0_i32_1 = arith.constant 0 : i32
    return %c0_i32, %c0_i32_0 : i32, i32
  }
  func.func @transform_7(%arg0: i32) -> (i32, i32) {
    %c0_i32 = arith.constant 0 : i32
    %c0_i32_0 = arith.constant 0 : i32
    return %arg0, %c0_i32 : i32, i32
  }
}

</mosaic_0001>

<bundles_post_ra>
// kernel: regressor_forward.1
= control target key start
LH: loop header
LB: loop body
LE: loop exit
PB: predicated region body
PF: predicated region fallthrough
CT: control target
= control target key end

     0   :  { %v412_v0 = vmov 0.0|0.0   ;;  %vm413_vm0 = vmmov 0   ;;  %v414_v4 = vmov 0.0   ;;  %vm47_vm1 = vcmask 1041408   ;;  %s530_s1 = inlined_call_operand.vmem [shape: f32[50,50], index: 1, kind: input, shape index: {}]   ;;  %s531_s3 = inlined_call_operand.vmem [shape: f32[50,25], index: 3, kind: input, shape index: {}]   ;;  %s532_s0 = inlined_call_operand.vmem [shape: f32[8,50], index: 0, kind: input, shape index: {}]   ;;  %s533_s5 = inlined_call_operand.vmem [shape: f32[25,1], index: 5, kind: input, shape index: {}]   ;;  %s534_s2 = inlined_call_operand.vmem [shape: f32[1,50], index: 2, kind: input, shape index: {}]   ;;  %s535_s6 = inlined_call_operand.<no memory space> [shape: f32[1,1], index: 6, kind: input, shape index: {}]   ;;  %s536_s4 = inlined_call_operand.vmem [shape: f32[1,25], index: 4, kind: input, shape index: {}]   ;;  %s537_s7 = inlined_call_operand.vmem [shape: f32[8,1], index: 7, kind: output, shape index: {}]  }
   0x1   :  { %383 = vmatprep.subr.bf16.mxu0 %v412_v0  ;;  %v29_v1 = vld [vmem:[%s530_s1] sm:$0xff]  ;;  %v30_v2 = vld [vmem:[%s530_s1 + $0x8] sm:$0xff]  ;;  %v31_v3 = vld [vmem:[%s530_s1 + $0x10] sm:$0xff]  ;;  %352 = vmatprep.mubr.msk.f32.mxu0 %vm413_vm0, %v414_v4  ;;  %vm43_vm2 = vcmask 408576   ;;  %vm228_vm3 = vcmask 1040384   ;;  %vm415_vm4 = vmmov 1   ;;  %v12_v34 = vstv %s535_s6 }
   0x2   :  { %v384_v5 = vpack.c.bf16 %v30_v2, %v29_v1  ;;  %v32_v6 = vld [vmem:[%s530_s1 + $0x18] sm:$0xff]  ;;  %392 = vmatprep.subr.bf16.mxu1 %v412_v0  ;;  %369 = vmatprep.mubr.msk.f32.mxu1 %vm413_vm0, %v414_v4  ;;  %v122_v7 = vld [vmem:[%s531_s3] sm:$0xff]  ;;  %v123_v9 = vld [vmem:[%s531_s3 + $0x8] sm:$0xff]  ;;  %13 = vst [vmem:[#allocation2] sm:$0x1] %v12_v34  ;;  %vm224_vm6 = vcmask 203776  }
   0x3   :  { %v387_v8 = vpack.c.bf16 %v32_v6, %v31_v3  ;;  %v124_v10 = vld [vmem:[%s531_s3 + $0x10] sm:$0xff]  ;;  %v125_v11 = vld [vmem:[%s531_s3 + $0x18] sm:$0xff]  ;;  %v33_v12 = vld [vmem:[%s530_s1 + $0x20] sm:$0xff]  ;;  %v393_v14 = vpack.c.bf16 %v123_v9, %v122_v7  ;;  %vm302_vm7 = vcmask 7168  }
   0x4   :  { %385 = vmatpush3.bf16.msra.mxu0 %v384_v5  ;;  %v34_v13 = vld [vmem:[%s530_s1 + $0x28] sm:$0xff]  ;;  %v396_v15 = vpack.c.bf16 %v125_v11, %v124_v10  ;;  %v35_v17 = vld [vmem:[%s530_s1 + $0x30] sm:$0x3]  ;;  %v28_v18 = vld [vmem:[%s532_s0] sm:$0xff] }
   0x5   :  { %386 = vmatprep.subr.bf16.mxu0 %v412_v0  ;;  %394 = vmatpush3.bf16.msra.mxu1 %v393_v14  ;;  %v390_v16 = vpack.c.bf16 %v34_v13, %v33_v12  ;;  %v126_v19 = vld [vmem:[%s531_s3 + $0x20] sm:$0xff]  ;;  %v127_v20 = vld [vmem:[%s531_s3 + $0x28] sm:$0xff]  ;;  %v128_v22 = vld [vmem:[%s531_s3 + $0x30] sm:$0x3] }
   0x6   :  { %395 = vmatprep.subr.bf16.mxu1 %v412_v0  ;;  %v399_v21 = vpack.c.bf16 %v127_v20, %v126_v19  ;;  %v213_v23 = vld [vmem:[%s533_s5] sm:$0xff]  ;;  %v214_v24 = vld [vmem:[%s533_s5 + $0x8] sm:$0xff]  ;;  %v215_v31 = vld [vmem:[%s533_s5 + $0x10] sm:$0xff] }
   0x7   :  { %v402_v25 = vpack.c.bf16 %v214_v24, %v213_v23  ;;  %v308_v26 = vld [vmem:[%s534_s2] ss:$0 sm:$0xff]  ;;  %v216_v32 = vld [vmem:[%s533_s5 + $0x18] sm:$0x1]  ;;  %vm406_vm5 = vmpackc.low %vm228_vm3, %vm415_vm4 }
   0x8   :  { %388 = vmatpush3.bf16.msra.mxu0 %v387_v8  ;;  %v405_v33 = vpack.c.bf16 %v216_v32, %v215_v31  ;;  %v311_v35 = vld [vmem:[%s536_s4] ss:$0 sm:$0xff] }
   0x9   :  { %389 = vmatprep.subr.bf16.mxu0 %v412_v0  ;;  %397 = vmatpush3.bf16.msra.mxu1 %v396_v15  ;;  %v314_v40 = vld [vmem:[#allocation2] ss:$0 sm:$0xff] }
   0xa   :  { %398 = vmatprep.subr.bf16.mxu1 %v412_v0 }
   0xc   :  { %391 = vmatpush3.bf16.msra.mxu0 %v390_v16 }
   0xd   :  { %350 = vmatprep.subr.mxu0 %v414_v4  ;;  %400 = vmatpush3.bf16.msra.mxu1 %v399_v21 }
   0xe   :  { %367 = vmatprep.subr.mxu1 %v414_v4 }
  0x10   :  { %351 = vmatpush3.msk.msra.mxu0 %vm47_vm1, %v35_v17 }
  0x11   :  { %353 = vmatmul.mubr.msk.f32.vlgmr.msra.gmra.mrb[0].mxu0 %vm43_vm2, %v28_v18  ;;  %401 = vmatprep.subr.bf16.mxu0 %v412_v0 }
  0x12   :  { %380 = vmatprep.mubr.msk.f32.mxu0 %vm413_vm0, %v414_v4  ;;  %368 = vmatpush3.msk.msra.mxu1 %vm47_vm1, %v128_v22 }
  0x13   :  { %403 = vmatpush3.bf16.msra.mxu0 %v402_v25 }
  0x14   :  { %404 = vmatprep.subr.bf16.mxu0 %v412_v0 }
  0x17   :  { %407 = vmatpush3.bf16.msk.msra.mxu0 %vm406_vm5, %v405_v33 }
  0xe4   :  { %v117_v27 = vpop.f32.mrb[0].mxu0 }
  0xe5   :  { %v118_v28 = vadd.f32 %v308_v26, %v117_v27  ;;  %v354_v29 = vpop.f32.mrb[1].mxu0 }
  0xe7   :  { %v121_v30 = vmax.f32 %v118_v28, 0.0 }
  0xe9   :  { %370 = vmatmul.mubr.msk.f32.vlgmr.msra.gmra.mrb[0].mxu1 %vm43_vm2, %v121_v30 }
 0x1bc   :  { %v208_v36 = vpop.f32.mrb[0].mxu1 }
 0x1bd   :  { %v209_v37 = vadd.f32 %v311_v35, %v208_v36  ;;  %v371_v38 = vpop.f32.mrb[1].mxu1 }
 0x1bf   :  { %v212_v39 = vmax.f32 %v209_v37, 0.0 }
 0x1c1   :  { %381 = vmatmul.mubr.msk.f32.vlgmr.msra.gmra.mrb[2].mxu0 %vm224_vm6, %v212_v39 }
 0x294   :  { %v298_v41 = vpop.f32.mrb[2].mxu0 }
 0x295   :  { %v299_v42 = vadd.f32 %v314_v40, %v298_v41  ;;  %v382_v43 = vpop.f32.mrb[3].mxu0 }
 0x297   :  { %303 = vst.msk [vmem:[%s537_s7] sm:$0xff] %vm302_vm7, %v299_v42 }

</bundles_post_ra>
